<compile_context>
chip_gen: v7x
topology: tpu7x:2x2x1
jax: 0.10.0
libtpu: 0.0.40
codegen_flags: <defaults>
</compile_context>

<pallas_src>
import functools
import math

import jax
import jax.numpy as jnp
from jax.experimental import pallas as pl
from jax.experimental.pallas import tpu as pltpu


def _round_up(a, b):
    return (a + b - 1) // b * b


def _pad2(a, rows, cols):
    """Zero-pad a 2-D array to (rows, cols); no-op if already that shape."""
    pr, pc = rows - a.shape[0], cols - a.shape[1]
    if pr == 0 and pc == 0:
        return a
    return jnp.pad(a, ((0, pr), (0, pc)))


def _ffn_kernel(x_ref, w1_ref, b1_ref, w2_ref, b2_ref, g_ref, beta_ref,
                o_ref, acc_ref, *, d_in, eps):
    k = pl.program_id(1)

    @pl.when(k == 0)
    def _init():
        acc_ref[...] = jnp.zeros_like(acc_ref)

    # ---- Linear 1 chunk + ReLU (MXU, f32 accumulate; inputs stay in storage dtype)
    h = jnp.dot(x_ref[...], w1_ref[...], preferred_element_type=jnp.float32)
    h = jnp.maximum(h + b1_ref[...].astype(jnp.float32), 0.0)

    # ---- Linear 2 chunk, accumulated into the resident f32 scratch
    acc_ref[...] += jnp.dot(h.astype(w2_ref.dtype), w2_ref[...],
                            preferred_element_type=jnp.float32)

    # ---- Epilogue on the last hidden-dim chunk
    @pl.when(k == pl.num_programs(1) - 1)
    def _finalize():
        # Dropout: identity in eval mode. Residual add in f32.
        y = (acc_ref[...]
             + b2_ref[...].astype(jnp.float32)
             + x_ref[...].astype(jnp.float32))

        # One-pass LayerNorm statistics. Padded feature columns of y are
        # exactly zero (zero-padded W2 cols / b2 / residual), so dividing the
        # raw sums by the real d_in gives the correct mean / biased variance.
        inv_d = jnp.float32(1.0 / d_in)
        s1 = jnp.sum(y, axis=-1, keepdims=True)
        s2 = jnp.sum(y * y, axis=-1, keepdims=True)
        mean = s1 * inv_d
        var = jnp.maximum(s2 * inv_d - mean * mean, 0.0)
        y_norm = (y - mean) * jax.lax.rsqrt(var + eps)
        out = (y_norm * g_ref[...].astype(jnp.float32)
               + beta_ref[...].astype(jnp.float32))
        o_ref[...] = out.astype(o_ref.dtype)


def positionwise_feed_forward(x, w1, b1, w2, b2, gamma, beta, *,
                              tm=256, tk_target=2048, eps=1e-6):
    """x: [B, S, d_in]; w1: [d_in, d_hid]; w2: [d_hid, d_in] (transposed vs torch)."""
    B, S, d_in = x.shape
    d_hid = w1.shape[1]
    N = B * S

    # Row tile: multiple of sublane packing (8 f32 / 16 bf16), capped by N.
    sub = 16 if x.dtype == jnp.bfloat16 else 8
    tm = max(sub, min(_round_up(tm, sub), _round_up(N, sub)))
    n_p = _round_up(N, tm)

    # Lane-dense feature dims (multiples of 128).
    d_in_p = _round_up(d_in, 128)
    n_k = max(1, -(-d_hid // tk_target))          # number of hidden-dim chunks
    tk = _round_up(-(-d_hid // n_k), 128)         # chunk width (128-multiple)
    d_hid_p = n_k * tk

    # Zero-pad everything (padding is mathematically inert, see kernel notes).
    x2 = _pad2(x.reshape(N, d_in), n_p, d_in_p)
    w1_p = _pad2(w1, d_in_p, d_hid_p)
    b1_p = _pad2(b1.reshape(1, d_hid), 1, d_hid_p)
    w2_p = _pad2(w2, d_hid_p, d_in_p)
    b2_p = _pad2(b2.reshape(1, d_in), 1, d_in_p)
    g_p = _pad2(gamma.reshape(1, d_in), 1, d_in_p)
    be_p = _pad2(beta.reshape(1, d_in), 1, d_in_p)

    kernel = functools.partial(_ffn_kernel, d_in=d_in, eps=eps)

    out = pl.pallas_call(
        kernel,
        out_shape=jax.ShapeDtypeStruct((n_p, d_in_p), x.dtype),
        grid_spec=pltpu.PrefetchScalarGridSpec(
            num_scalar_prefetch=0,
            grid=(n_p // tm, n_k),
            in_specs=[
                pl.BlockSpec((tm, d_in_p), lambda i, k: (i, 0)),     # x rows
                pl.BlockSpec((d_in_p, tk), lambda i, k: (0, k)),     # W1 chunk
                pl.BlockSpec((1, tk), lambda i, k: (0, k)),          # b1 chunk
                pl.BlockSpec((tk, d_in_p), lambda i, k: (k, 0)),     # W2 chunk
                pl.BlockSpec((1, d_in_p), lambda i, k: (0, 0)),      # b2
                pl.BlockSpec((1, d_in_p), lambda i, k: (0, 0)),      # gamma
                pl.BlockSpec((1, d_in_p), lambda i, k: (0, 0)),      # beta
            ],
            out_specs=pl.BlockSpec((tm, d_in_p), lambda i, k: (i, 0)),
            scratch_shapes=[pltpu.VMEM((tm, d_in_p), jnp.float32)],  # y accum
        ),
        compiler_params=pltpu.CompilerParams(
            dimension_semantics=("parallel", "arbitrary"),
            vmem_limit_bytes=64 * 1024 * 1024),
    )(x2, w1_p, b1_p, w2_p, b2_p, g_p, be_p)

    return out[:N, :d_in].reshape(B, S, d_in)


def _reference(x, w1, b1, w2, b2, gamma, beta):
    h = jnp.maximum(x @ w1 + b1, 0.0)
    y = h @ w2 + b2
    y = y + x
    mean = jnp.mean(y, axis=-1, keepdims=True)
    var = jnp.mean((y - mean) ** 2, axis=-1, keepdims=True)
    return (y - mean) * jax.lax.rsqrt(var + 1e-6) * gamma + beta


if __name__ == "__main__":
    # Small, deterministic example: batch=2, seq=8, d_in=32, d_hid=64
    B, S, d_in, d_hid = 2, 8, 32, 64
    key = jax.random.PRNGKey(0)
    kx, k1, kb1, k2, kb2 = jax.random.split(key, 5)

    x = jax.random.normal(kx, (B, S, d_in), dtype=jnp.float32)

    # Deterministic parameter init (uniform, PyTorch-Linear-style fan-in bound)
    bound1 = 1.0 / math.sqrt(d_in)
    bound2 = 1.0 / math.sqrt(d_hid)
    w1 = jax.random.uniform(k1, (d_in, d_hid), minval=-bound1, maxval=bound1,
                            dtype=jnp.float32)
    b1 = jax.random.uniform(kb1, (d_hid,), minval=-bound1, maxval=bound1,
                            dtype=jnp.float32)
    w2 = jax.random.uniform(k2, (d_hid, d_in), minval=-bound2, maxval=bound2,
                            dtype=jnp.float32)
    b2 = jax.random.uniform(kb2, (d_in,), minval=-bound2, maxval=bound2,
                            dtype=jnp.float32)
    gamma = jnp.ones((d_in,), dtype=jnp.float32)
    beta = jnp.zeros((d_in,), dtype=jnp.float32)

    out = positionwise_feed_forward(x, w1, b1, w2, b2, gamma, beta)
    out = jax.block_until_ready(out)

    ref = _reference(x, w1, b1, w2, b2, gamma, beta)
    assert out.shape == (B, S, d_in)
    assert jnp.allclose(out, ref, atol=1e-4, rtol=1e-4), "mismatch vs reference"

    print("KERNEL_OK")
</pallas_src>

<mosaic_0001>
module attributes {stable_mosaic.version = 11 : i64} {
  func.func @_ffn_kernel(%arg0: i32, %arg1: i32, %arg2: memref<16x128xf32, #tpu.memory_space<vmem>>, %arg3: memref<128x128xf32, #tpu.memory_space<vmem>>, %arg4: memref<1x128xf32, #tpu.memory_space<vmem>>, %arg5: memref<128x128xf32, #tpu.memory_space<vmem>>, %arg6: memref<1x128xf32, #tpu.memory_space<vmem>>, %arg7: memref<1x128xf32, #tpu.memory_space<vmem>>, %arg8: memref<1x128xf32, #tpu.memory_space<vmem>>, %arg9: memref<16x128xf32, #tpu.memory_space<vmem>>, %arg10: memref<16x128xf32, #tpu.memory_space<vmem>>) attributes {dimension_semantics = [#tpu.dimension_semantics<parallel>, #tpu.dimension_semantics<arbitrary>], iteration_bounds = array<i64: 1, 1>, scalar_prefetch = 0 : i64, scratch_operands = 1 : i64, tpu.core_type = #tpu.core_type<tc>, window_params = [{transform_indices = @transform_0, window_bounds = array<i64: 16, 128>}, {transform_indices = @transform_1, window_bounds = array<i64: 128, 128>}, {transform_indices = @transform_2, window_bounds = array<i64: 1, 128>}, {transform_indices = @transform_3, window_bounds = array<i64: 128, 128>}, {pipeline_mode = #tpu.pipeline_mode<synchronous>, transform_indices = @transform_4, window_bounds = array<i64: 1, 128>}, {pipeline_mode = #tpu.pipeline_mode<synchronous>, transform_indices = @transform_5, window_bounds = array<i64: 1, 128>}, {pipeline_mode = #tpu.pipeline_mode<synchronous>, transform_indices = @transform_6, window_bounds = array<i64: 1, 128>}, {transform_indices = @transform_7, window_bounds = array<i64: 16, 128>}]} {
    %c0_i32 = arith.constant 0 : i32
    %0 = arith.cmpi eq, %arg1, %c0_i32 : i32
    %1 = arith.extui %0 : i1 to i32
    %c0_i32_0 = arith.constant 0 : i32
    %2 = arith.cmpi ne, %1, %c0_i32_0 : i32
    scf.if %2 {
      %cst_16 = arith.constant 0.000000e+00 : f32
      %19 = vector.broadcast %cst_16 : f32 to vector<16x128xf32>
      %c0_17 = arith.constant 0 : index
      %c0_18 = arith.constant 0 : index
      %20 = vector.load %arg10[%c0_17, %c0_18] : memref<16x128xf32, #tpu.memory_space<vmem>>, vector<16x128xf32>
      tpu.vector_store %arg10[%c0_17, %c0_18], %19 {strides = array<i32>} : memref<16x128xf32, #tpu.memory_space<vmem>>, vector<16x128xf32>,
    } else {
    }
    %c0 = arith.constant 0 : index
    %c0_1 = arith.constant 0 : index
    %3 = vector.load %arg2[%c0, %c0_1] : memref<16x128xf32, #tpu.memory_space<vmem>>, vector<16x128xf32>
    %c0_2 = arith.constant 0 : index
    %c0_3 = arith.constant 0 : index
    %4 = vector.load %arg3[%c0_2, %c0_3] : memref<128x128xf32, #tpu.memory_space<vmem>>, vector<128x128xf32>
    %cst = arith.constant dense<0.000000e+00> : vector<16x128xf32>
    %5 = tpu.matmul %3, %4, %cst {dimension_numbers = #tpu.dot_dimension_numbers<[1], [0], [0], [1], [0, 0, 1, 1], [], []>} : vector<16x128xf32>, vector<128x128xf32>, vector<16x128xf32> -> vector<16x128xf32>
    %c0_4 = arith.constant 0 : index
    %c0_5 = arith.constant 0 : index
    %6 = vector.load %arg4[%c0_4, %c0_5] : memref<1x128xf32, #tpu.memory_space<vmem>>, vector<1x128xf32>
    %7 = vector.broadcast %6 : vector<1x128xf32> to vector<16x128xf32>
    %8 = arith.addf %5, %7 : vector<16x128xf32>
    %cst_6 = arith.constant 0.000000e+00 : f32
    %9 = vector.broadcast %cst_6 : f32 to vector<16x128xf32>
    %10 = arith.maximumf %8, %9 : vector<16x128xf32>
    %c0_7 = arith.constant 0 : index
    %c0_8 = arith.constant 0 : index
    %11 = vector.load %arg10[%c0_7, %c0_8] : memref<16x128xf32, #tpu.memory_space<vmem>>, vector<16x128xf32>
    %c0_9 = arith.constant 0 : index
    %c0_10 = arith.constant 0 : index
    %12 = vector.load %arg5[%c0_9, %c0_10] : memref<128x128xf32, #tpu.memory_space<vmem>>, vector<128x128xf32>
    %cst_11 = arith.constant dense<0.000000e+00> : vector<16x128xf32>
    %13 = tpu.matmul %10, %12, %cst_11 {dimension_numbers = #tpu.dot_dimension_numbers<[1], [0], [0], [1], [0, 0, 1, 1], [], []>} : vector<16x128xf32>, vector<128x128xf32>, vector<16x128xf32> -> vector<16x128xf32>
    %14 = arith.addf %11, %13 : vector<16x128xf32>
    %c0_12 = arith.constant 0 : index
    %c0_13 = arith.constant 0 : index
    %15 = vector.load %arg10[%c0_12, %c0_13] : memref<16x128xf32, #tpu.memory_space<vmem>>, vector<16x128xf32>
    tpu.vector_store %arg10[%c0_12, %c0_13], %14 {strides = array<i32>} : memref<16x128xf32, #tpu.memory_space<vmem>>, vector<16x128xf32>,
    %c0_i32_14 = arith.constant 0 : i32
    %16 = arith.cmpi eq, %arg1, %c0_i32_14 : i32
    %17 = arith.extui %16 : i1 to i32
    %c0_i32_15 = arith.constant 0 : i32
    %18 = arith.cmpi ne, %17, %c0_i32_15 : i32
    scf.if %18 {
      %c0_16 = arith.constant 0 : index
      %c0_17 = arith.constant 0 : index
      %19 = vector.load %arg10[%c0_16, %c0_17] : memref<16x128xf32, #tpu.memory_space<vmem>>, vector<16x128xf32>
      %c0_18 = arith.constant 0 : index
      %c0_19 = arith.constant 0 : index
      %20 = vector.load %arg6[%c0_18, %c0_19] : memref<1x128xf32, #tpu.memory_space<vmem>>, vector<1x128xf32>
      %21 = vector.broadcast %20 : vector<1x128xf32> to vector<16x128xf32>
      %22 = arith.addf %19, %21 : vector<16x128xf32>
      %c0_20 = arith.constant 0 : index
      %c0_21 = arith.constant 0 : index
      %23 = vector.load %arg2[%c0_20, %c0_21] : memref<16x128xf32, #tpu.memory_space<vmem>>, vector<16x128xf32>
      %24 = arith.addf %22, %23 : vector<16x128xf32>
      %cst_22 = arith.constant dense<0.000000e+00> : vector<16xf32>
      %25 = vector.multi_reduction <add>, %24, %cst_22 [1] : vector<16x128xf32> to vector<16xf32>
      %26 = vector.shape_cast %25 : vector<16xf32> to vector<16x1xf32>
      %27 = arith.mulf %24, %24 : vector<16x128xf32>
      %cst_23 = arith.constant dense<0.000000e+00> : vector<16xf32>
      %28 = vector.multi_reduction <add>, %27, %cst_23 [1] : vector<16x128xf32> to vector<16xf32>
      %29 = vector.shape_cast %28 : vector<16xf32> to vector<16x1xf32>
      %cst_24 = arith.constant 3.125000e-02 : f32
      %30 = vector.broadcast %cst_24 : f32 to vector<16x1xf32>
      %31 = arith.mulf %26, %30 : vector<16x1xf32>
      %cst_25 = arith.constant 3.125000e-02 : f32
      %32 = vector.broadcast %cst_25 : f32 to vector<16x1xf32>
      %33 = arith.mulf %29, %32 : vector<16x1xf32>
      %34 = arith.mulf %31, %31 : vector<16x1xf32>
      %35 = arith.subf %33, %34 : vector<16x1xf32>
      %cst_26 = arith.constant 0.000000e+00 : f32
      %36 = vector.broadcast %cst_26 : f32 to vector<16x1xf32>
      %37 = arith.maximumf %35, %36 : vector<16x1xf32>
      %38 = vector.broadcast %31 : vector<16x1xf32> to vector<16x128xf32>
      %39 = arith.subf %24, %38 : vector<16x128xf32>
      %cst_27 = arith.constant 9.99999997E-7 : f32
      %40 = vector.broadcast %cst_27 : f32 to vector<16x1xf32>
      %41 = arith.addf %37, %40 : vector<16x1xf32>
      %42 = math.rsqrt %41 : vector<16x1xf32>
      %43 = vector.broadcast %42 : vector<16x1xf32> to vector<16x128xf32>
      %44 = arith.mulf %39, %43 : vector<16x128xf32>
      %c0_28 = arith.constant 0 : index
      %c0_29 = arith.constant 0 : index
      %45 = vector.load %arg7[%c0_28, %c0_29] : memref<1x128xf32, #tpu.memory_space<vmem>>, vector<1x128xf32>
      %46 = vector.broadcast %45 : vector<1x128xf32> to vector<16x128xf32>
      %47 = arith.mulf %44, %46 : vector<16x128xf32>
      %c0_30 = arith.constant 0 : index
      %c0_31 = arith.constant 0 : index
      %48 = vector.load %arg8[%c0_30, %c0_31] : memref<1x128xf32, #tpu.memory_space<vmem>>, vector<1x128xf32>
      %49 = vector.broadcast %48 : vector<1x128xf32> to vector<16x128xf32>
      %50 = arith.addf %47, %49 : vector<16x128xf32>
      %c0_32 = arith.constant 0 : index
      %c0_33 = arith.constant 0 : index
      %51 = vector.load %arg9[%c0_32, %c0_33] : memref<16x128xf32, #tpu.memory_space<vmem>>, vector<16x128xf32>
      tpu.vector_store %arg9[%c0_32, %c0_33], %50 {strides = array<i32>} : memref<16x128xf32, #tpu.memory_space<vmem>>, vector<16x128xf32>,
    } else {
    }
    return
  }
  func.func @transform_0(%arg0: i32, %arg1: i32) -> (i32, i32) {
    %c0_i32 = arith.constant 0 : i32
    %c0_i32_0 = arith.constant 0 : i32
    return %arg0, %c0_i32 : i32, i32
  }
  func.func @transform_1(%arg0: i32, %arg1: i32) -> (i32, i32) {
    %c0_i32 = arith.constant 0 : i32
    %c0_i32_0 = arith.constant 0 : i32
    return %c0_i32, %arg1 : i32, i32
  }
  func.func @transform_2(%arg0: i32, %arg1: i32) -> (i32, i32) {
    %c0_i32 = arith.constant 0 : i32
    %c0_i32_0 = arith.constant 0 : i32
    return %c0_i32, %arg1 : i32, i32
  }
  func.func @transform_3(%arg0: i32, %arg1: i32) -> (i32, i32) {
    %c0_i32 = arith.constant 0 : i32
    %c0_i32_0 = arith.constant 0 : i32
    return %arg1, %c0_i32 : i32, i32
  }
  func.func @transform_4(%arg0: i32, %arg1: i32) -> (i32, i32) {
    %c0_i32 = arith.constant 0 : i32
    %c0_i32_0 = arith.constant 0 : i32
    %c0_i32_1 = arith.constant 0 : i32
    return %c0_i32, %c0_i32_0 : i32, i32
  }
  func.func @transform_5(%arg0: i32, %arg1: i32) -> (i32, i32) {
    %c0_i32 = arith.constant 0 : i32
    %c0_i32_0 = arith.constant 0 : i32
    %c0_i32_1 = arith.constant 0 : i32
    return %c0_i32, %c0_i32_0 : i32, i32
  }
  func.func @transform_6(%arg0: i32, %arg1: i32) -> (i32, i32) {
    %c0_i32 = arith.constant 0 : i32
    %c0_i32_0 = arith.constant 0 : i32
    %c0_i32_1 = arith.constant 0 : i32
    return %c0_i32, %c0_i32_0 : i32, i32
  }
  func.func @transform_7(%arg0: i32, %arg1: i32) -> (i32, i32) {
    %c0_i32 = arith.constant 0 : i32
    %c0_i32_0 = arith.constant 0 : i32
    return %arg0, %c0_i32 : i32, i32
  }
}

</mosaic_0001>

<bundles_post_ra>
// kernel: tpu_custom_call.1
= control target key start
LH: loop header
LB: loop body
LE: loop exit
PB: predicated region body
PF: predicated region fallthrough
CT: control target
= control target key end

     0   :  { %12 = vsyncpa [#allocation4], 0  ;;  %s955_s0 = inlined_call_operand.hbm [shape: f32[16,128], index: 0, kind: input, shape index: {}]   ;;  %s956_s1 = inlined_call_operand.hbm [shape: f32[128,128], index: 1, kind: input, shape index: {}]   ;;  %s957_s2 = inlined_call_operand.hbm [shape: f32[1,128], index: 2, kind: input, shape index: {}]   ;;  %s958_s3 = inlined_call_operand.hbm [shape: f32[128,128], index: 3, kind: input, shape index: {}]   ;;  %s959_s4 = inlined_call_operand.hbm [shape: f32[1,128], index: 4, kind: input, shape index: {}]   ;;  %s960_s5 = inlined_call_operand.hbm [shape: f32[1,128], index: 5, kind: input, shape index: {}]   ;;  %s961_s6 = inlined_call_operand.hbm [shape: f32[1,128], index: 6, kind: input, shape index: {}]   ;;  %s962_s7 = inlined_call_operand.hbm [shape: f32[16,128], index: 7, kind: output, shape index: {}]  }
   0x1   :  { %13 = vsyncpa [#allocation7], 0 }
   0x2   :  { %14 = vsyncpa [#allocation10], 0 }
   0x3   :  { %15 = vsyncpa [#allocation13], 0 }
   0x4   :  { %16 = vsyncpa [#allocation5], 0  ;;  %s779_s24 = smov [#allocation6]   ;;  %s780_s26 = smov [#allocation9]  }
   0x5   :  { %s34_s25 = sshll.u32 %s779_s24, 4  ;;  %s56_s27 = sshll.u32 %s780_s26, 4  ;;  %s35_s25 = int_to_ptr.vmem [resolvable:$true] %s34_s25  ;;  %s829_s27 = int_to_ptr.vmem [resolvable:$true] %s56_s27 }
   0x6   :  { %s593_s30 = scalar_lea.hbm %s956_s1, 2048 }
   0x7   :  { %p594_p0 = scmp.ne.s32.totalorder %s956_s1, %s593_s30  ;;  %p597_p1 = scmp.lt.u32.totalorder %s593_s30, %s956_s1 }
   0x9   :  { %p599_p2 = pnand %p597_p1, %p594_p0 }
   0xb   :  { %602 = shalt.err (!%p599_p2)
}
   0xc   :  { %s603_s12 = scalar_lea.vmem %s35_s25, 2048  ;;  %p608_p4 = scmp.lt.s32.totalorder %s35_s25, %s35_s25 }
   0xd   :  { %p604_p3 = scmp.ne.s32.totalorder %s35_s25, %s603_s12  ;;  %p609_p5 = scmp.lt.s32.totalorder %s603_s12, %s603_s12 }
   0xf   :  { %p610_p6 = por %p609_p5, %p608_p4 }
  0x11   :  { %p611_p7 = pnand %p610_p6, %p604_p3 }
  0x13   :  { %614 = shalt.err (!%p611_p7)
}
  0x14   :  { %s781_s13 = smov 128   ;;  %s782_s14 = smov 8  }
  0x15   :  { %40 = dma.hbm_to_vmem [thread:$0]  %s956_s1, 2048, %s35_s25, [#allocation7], %s781_s13, %s781_s13, %s782_s14  }
  0x16   :  { %s615_s19 = scalar_lea.hbm %s958_s3, 2048 }
  0x17   :  { %p616_p8 = scmp.ne.s32.totalorder %s958_s3, %s615_s19  ;;  %p619_p9 = scmp.lt.u32.totalorder %s615_s19, %s958_s3 }
  0x19   :  { %p621_p10 = pnand %p619_p9, %p616_p8 }
  0x1b   :  { %624 = shalt.err (!%p621_p10)
}
  0x1c   :  { %s625_s24 = scalar_lea.vmem %s829_s27, 2048  ;;  %p630_p12 = scmp.lt.s32.totalorder %s829_s27, %s829_s27 }
  0x1d   :  { %p626_p11 = scmp.ne.s32.totalorder %s829_s27, %s625_s24  ;;  %p631_p13 = scmp.lt.s32.totalorder %s625_s24, %s625_s24 }
  0x1f   :  { %p632_p0 = por %p631_p13, %p630_p12 }
  0x21   :  { %p633_p1 = pnand %p632_p0, %p626_p11 }
  0x23   :  { %636 = shalt.err (!%p633_p1)
}
  0x24   :  { %62 = dma.hbm_to_vmem [thread:$0]  %s958_s3, 2048, %s829_s27, [#allocation10], %s781_s13, %s781_s13, %s782_s14  }
  0x25   :  { %s783_s26 = smov [#allocation12]   ;;  %s784_s29 = smov [#allocation3]  }
  0x26   :  { %s79_s28 = sshll.u32 %s783_s26, 4  ;;  %s22_s30 = sshll.u32 %s784_s29, 4  ;;  %s80_s28 = int_to_ptr.vmem [resolvable:$true] %s79_s28  ;;  %s866_s30 = int_to_ptr.vmem [resolvable:$true] %s22_s30 }
  0x27   :  { %s637_s10 = scalar_lea.hbm %s960_s5, 16 }
  0x28   :  { %p638_p2 = scmp.ne.s32.totalorder %s960_s5, %s637_s10  ;;  %p641_p3 = scmp.lt.u32.totalorder %s637_s10, %s960_s5 }
  0x2a   :  { %p643_p4 = pnand %p641_p3, %p638_p2 }
  0x2c   :  { %646 = shalt.err (!%p643_p4)
}
  0x2d   :  { %s647_s3 = scalar_lea.vmem %s80_s28, 16  ;;  %s651_s27 = scalar_lea.vmem %s80_s28, 32 }
  0x2e   :  { %p648_p5 = scmp.ne.s32.totalorder %s80_s28, %s647_s3  ;;  %p652_p6 = scmp.lt.s32.totalorder %s80_s28, %s80_s28 }
  0x2f   :  { %p653_p7 = scmp.lt.s32.totalorder %s651_s27, %s647_s3 }
  0x31   :  { %p654_p8 = por %p653_p7, %p652_p6 }
  0x33   :  { %p655_p9 = pnand %p654_p8, %p648_p5 }
  0x35   :  { %658 = shalt.err (!%p655_p9)
}
  0x36   :  { %82 = dma.hbm_to_vmem [thread:$0]  %s960_s5, 16, %s80_s28, [#allocation13]  }
  0x37   :  { %s659_s21 = scalar_lea.hbm %s955_s0, 256 }
  0x38   :  { %p660_p10 = scmp.ne.s32.totalorder %s955_s0, %s659_s21  ;;  %p663_p11 = scmp.lt.u32.totalorder %s659_s21, %s955_s0 }
  0x3a   :  { %p665_p12 = pnand %p663_p11, %p660_p10 }
  0x3c   :  { %668 = shalt.err (!%p665_p12)
}
  0x3d   :  { %s669_s25 = scalar_lea.vmem %s866_s30, 256  ;;  %p674_p0 = scmp.lt.s32.totalorder %s866_s30, %s866_s30 }
  0x3e   :  { %p670_p13 = scmp.ne.s32.totalorder %s866_s30, %s669_s25  ;;  %p675_p1 = scmp.lt.s32.totalorder %s669_s25, %s669_s25 }
  0x40   :  { %p676_p2 = por %p675_p1, %p674_p0 }
  0x42   :  { %p677_p3 = pnand %p676_p2, %p670_p13 }
  0x44   :  { %680 = shalt.err (!%p677_p3)
}
  0x45   :  { %28 = dma.hbm_to_vmem [thread:$0]  %s955_s0, 256, %s866_s30, [#allocation4], %s781_s13, %s781_s13, %s782_s14  }
  0x46   :  { %s785_s28 = smov [#allocation8]   ;;  %s786_s8 = smov [#allocation11]  }
  0x47   :  { %s47_s29 = sshll.u32 %s785_s28, 4  ;;  %s69_s9 = sshll.u32 %s786_s8, 4  ;;  %s48_s29 = int_to_ptr.vmem [resolvable:$true] %s47_s29  ;;  %s70_s9 = int_to_ptr.vmem [resolvable:$true] %s69_s9 }
  0x48   :  { %s681_s12 = scalar_lea.hbm %s957_s2, 16 }
  0x49   :  { %p682_p4 = scmp.ne.s32.totalorder %s957_s2, %s681_s12  ;;  %p685_p5 = scmp.lt.u32.totalorder %s681_s12, %s957_s2 }
  0x4b   :  { %p687_p6 = pnand %p685_p5, %p682_p4 }
  0x4d   :  { %690 = shalt.err (!%p687_p6)
}
  0x4e   :  { %s691_s0 = scalar_lea.vmem %s48_s29, 16  ;;  %s695_s30 = scalar_lea.vmem %s48_s29, 32 }
  0x4f   :  { %p692_p7 = scmp.ne.s32.totalorder %s48_s29, %s691_s0  ;;  %p696_p8 = scmp.lt.s32.totalorder %s48_s29, %s48_s29 }
  0x50   :  { %p697_p9 = scmp.lt.s32.totalorder %s695_s30, %s691_s0 }
  0x52   :  { %p698_p10 = por %p697_p9, %p696_p8 }
  0x54   :  { %p699_p11 = pnand %p698_p10, %p692_p7 }
  0x56   :  { %702 = shalt.err (!%p699_p11)
}
  0x57   :  { %50 = dma.hbm_to_vmem [thread:$0]  %s957_s2, 16, %s48_s29, [#allocation7]  }
  0x58   :  { %s703_s21 = scalar_lea.hbm %s959_s4, 16 }
  0x59   :  { %p704_p12 = scmp.ne.s32.totalorder %s959_s4, %s703_s21  ;;  %p707_p13 = scmp.lt.u32.totalorder %s703_s21, %s959_s4 }
  0x5b   :  { %p709_p0 = pnand %p707_p13, %p704_p12 }
  0x5d   :  { %712 = shalt.err (!%p709_p0)
}
  0x5e   :  { %s713_s25 = scalar_lea.vmem %s70_s9, 16  ;;  %s717_s5 = scalar_lea.vmem %s70_s9, 32 }
  0x5f   :  { %p714_p1 = scmp.ne.s32.totalorder %s70_s9, %s713_s25  ;;  %p718_p2 = scmp.lt.s32.totalorder %s70_s9, %s70_s9 }
  0x60   :  { %p719_p3 = scmp.lt.s32.totalorder %s717_s5, %s713_s25 }
  0x62   :  { %p720_p4 = por %p719_p3, %p718_p2 }
  0x64   :  { %p721_p5 = pnand %p720_p4, %p714_p1 }
  0x66   :  { %724 = shalt.err (!%p721_p5)
}
  0x67   :  { %72 = dma.hbm_to_vmem [thread:$0]  %s959_s4, 16, %s70_s9, [#allocation10]  }
  0x68   :  { %s787_s28 = smov [#allocation14]   ;;  %s725_s11 = scalar_lea.hbm %s961_s6, 16 }
  0x69   :  { %s89_s29 = sshll.u32 %s787_s28, 4  ;;  %p726_p6 = scmp.ne.s32.totalorder %s961_s6, %s725_s11  ;;  %s90_s29 = int_to_ptr.vmem [resolvable:$true] %s89_s29 }
  0x6a   :  { %p729_p7 = scmp.lt.u32.totalorder %s725_s11, %s961_s6 }
  0x6c   :  { %p731_p8 = pnand %p729_p7, %p726_p6 }
  0x6e   :  { %734 = shalt.err (!%p731_p8)
}
  0x6f   :  { %s735_s27 = scalar_lea.vmem %s90_s29, 16  ;;  %s739_s4 = scalar_lea.vmem %s90_s29, 32 }
  0x70   :  { %p736_p9 = scmp.ne.s32.totalorder %s90_s29, %s735_s27  ;;  %p740_p10 = scmp.lt.s32.totalorder %s90_s29, %s90_s29 }
  0x71   :  { %p741_p11 = scmp.lt.s32.totalorder %s739_s4, %s735_s27 }
  0x73   :  { %p742_p12 = por %p741_p11, %p740_p10 }
  0x75   :  { %p743_p13 = pnand %p742_p12, %p736_p9 }
  0x77   :  { %746 = shalt.err (!%p743_p13)
}
  0x78   :  { %92 = dma.hbm_to_vmem [thread:$0]  %s961_s6, 16, %s90_s29, [#allocation13]  }
  0x79   :  { %769 = dma.done.wait [#allocation4], 256  }
  0x7a   :  { %770 = vsyncadd [#allocation4], 4294967040 }
  0x7b   :  { %771 = dma.done.wait [#allocation7], 2064  }
  0x7c   :  { %772 = vsyncadd [#allocation7], 4294965232 }
  0x7d   :  { %773 = dma.done.wait [#allocation10], 2064  }
  0x7e   :  { %774 = vsyncadd [#allocation10], 4294965232 }
  0x7f   :  { %775 = dma.done.wait [#allocation13], 32  }
  0x80   :  { %776 = vsyncadd [#allocation13], 4294967264  ;;  %v122_v0 = vld [vmem:[#allocation6] sm:$0xff]  ;;  %v123_v1 = vld [vmem:[#allocation6 + $0x8] sm:$0xff]  ;;  %s788_s6 = smov [#allocation15]  }
  0x81   :  { %v124_v2 = vld [vmem:[#allocation6 + $0x10] sm:$0xff]  ;;  %v515_v3 = vpack.c.bf16 %v123_v1, %v122_v0  ;;  %v125_v4 = vld [vmem:[#allocation6 + $0x18] sm:$0xff]  ;;  %v126_v6 = vld [vmem:[#allocation6 + $0x20] sm:$0xff]  ;;  %s390_s30 = sshll.u32 %s788_s6, 4  ;;  %s391_s30 = int_to_ptr.vmem [resolvable:$true] %s390_s30 }
  0x82   :  { %v519_v5 = vpack.c.bf16 %v125_v4, %v124_v2  ;;  %v127_v7 = vld [vmem:[#allocation6 + $0x28] sm:$0xff]  ;;  %v128_v9 = vld [vmem:[#allocation6 + $0x30] sm:$0xff]  ;;  %v129_v10 = vld [vmem:[#allocation6 + $0x38] sm:$0xff]  ;;  %s747_s17 = scalar_lea.vmem %s391_s30, 256  ;;  %p752_p1 = scmp.lt.s32.totalorder %s391_s30, %s391_s30 }
  0x83   :  { %516 = vmatprep.subr.bf16.mxu0 %v515_v3  ;;  %v523_v8 = vpack.c.bf16 %v127_v7, %v126_v6  ;;  %v936_v11 = vld [vmem:[#allocation3] sm:$0xff]  ;;  %v224_v12 = vld [vmem:[#allocation9] sm:$0xff]  ;;  %v227_v16 = vld [vmem:[#allocation9 + $0x18] sm:$0xff]  ;;  %v527_v20 = vpack.c.bf16 %v129_v10, %v128_v9  ;;  %p748_p0 = scmp.ne.s32.totalorder %s391_s30, %s747_s17  ;;  %p753_p2 = scmp.lt.s32.totalorder %s747_s17, %s747_s17 }
  0x84   :  { %518 = vmatpush3.bf16.msra.mxu0 %v515_v3  ;;  %477 = vmatprep.mubr.f32.mxu0 %v936_v11  ;;  %v225_v13 = vld [vmem:[#allocation9 + $0x8] sm:$0xff]  ;;  %v226_v14 = vld [vmem:[#allocation9 + $0x10] sm:$0xff]  ;;  %v228_v18 = vld [vmem:[#allocation9 + $0x20] sm:$0xff] }
  0x85   :  { %520 = vmatprep.subr.bf16.mxu0 %v519_v5  ;;  %v547_v15 = vpack.c.bf16 %v225_v13, %v224_v12  ;;  %v551_v17 = vpack.c.bf16 %v227_v16, %v226_v14  ;;  %v229_v19 = vld [vmem:[#allocation9 + $0x28] sm:$0xff]  ;;  %v130_v21 = vld [vmem:[#allocation6 + $0x40] sm:$0xff]  ;;  %v230_v24 = vld [vmem:[#allocation9 + $0x30] sm:$0xff]  ;;  %p754_p3 = por %p753_p2, %p752_p1 }
  0x86   :  { %v131_v22 = vld [vmem:[#allocation6 + $0x48] sm:$0xff]  ;;  %v555_v23 = vpack.c.bf16 %v229_v19, %v228_v18  ;;  %v231_v25 = vld [vmem:[#allocation9 + $0x38] sm:$0xff]  ;;  %v132_v27 = vld [vmem:[#allocation6 + $0x50] sm:$0xff] }
  0x87   :  { %548 = vmatprep.subr.bf16.mxu1 %v547_v15  ;;  %v531_v26 = vpack.c.bf16 %v131_v22, %v130_v21  ;;  %v133_v28 = vld [vmem:[#allocation6 + $0x58] sm:$0xff]  ;;  %v559_v29 = vpack.c.bf16 %v231_v25, %v230_v24  ;;  %v232_v30 = vld [vmem:[#allocation9 + $0x40] sm:$0xff]  ;;  %v233_v31 = vld [vmem:[#allocation9 + $0x48] sm:$0xff]  ;;  %p755_p4 = pnand %p754_p3, %p748_p0 }
  0x88   :  { %522 = vmatpush3.bf16.msra.mxu0 %v519_v5  ;;  %550 = vmatpush3.bf16.msra.mxu1 %v547_v15  ;;  %v535_v32 = vpack.c.bf16 %v133_v28, %v132_v27  ;;  %v134_v33 = vld [vmem:[#allocation6 + $0x60] sm:$0xff]  ;;  %v135_v34 = vld [vmem:[#allocation6 + $0x68] sm:$0xff]  ;;  %v563_v35 = vpack.c.bf16 %v233_v31, %v232_v30  ;;  %v234_v36 = vld [vmem:[#allocation9 + $0x50] sm:$0xff] }
  0x89   :  { %524 = vmatprep.subr.bf16.mxu0 %v523_v8  ;;  %552 = vmatprep.subr.bf16.mxu1 %v551_v17  ;;  %v235_v37 = vld [vmem:[#allocation9 + $0x58] sm:$0xff]  ;;  %v539_v38 = vpack.c.bf16 %v135_v34, %v134_v33  ;;  %v136_v39 = vld [vmem:[#allocation6 + $0x70] sm:$0xff]  ;;  %v236_v42 = vld [vmem:[#allocation9 + $0x60] sm:$0xff] }
  0x8a   :  { %v137_v40 = vld [vmem:[#allocation6 + $0x78] sm:$0xff]  ;;  %v567_v41 = vpack.c.bf16 %v235_v37, %v234_v36  ;;  %v237_v43 = vld [vmem:[#allocation9 + $0x68] sm:$0xff]  ;;  %v405_v50 = vld [vmem:[#allocation8] ss:$0 sm:$0xff] }
  0x8b   :  { %v543_v44 = vpack.c.bf16 %v137_v40, %v136_v39  ;;  %v571_v45 = vpack.c.bf16 %v237_v43, %v236_v42  ;;  %v121_v46 = vld [vmem:[#allocation3 + $0x8] sm:$0xff]  ;;  %v406_v57 = vld [vmem:[#allocation11] ss:$0 sm:$0xff]  ;;  %v408_v22 = vld [vmem:[#allocation14] ss:$0 sm:$0xff] }
  0x8c   :  { %526 = vmatpush3.bf16.msra.mxu0 %v523_v8  ;;  %554 = vmatpush3.bf16.msra.mxu1 %v551_v17  ;;  %v238_v47 = vld [vmem:[#allocation9 + $0x70] sm:$0xff]  ;;  %v239_v48 = vld [vmem:[#allocation9 + $0x78] sm:$0xff] }
  0x8d   :  { %528 = vmatprep.subr.bf16.mxu0 %v527_v20  ;;  %556 = vmatprep.subr.bf16.mxu1 %v555_v23  ;;  %v575_v49 = vpack.c.bf16 %v239_v48, %v238_v47 }
  0x90   :  { %530 = vmatpush3.bf16.msra.mxu0 %v527_v20  ;;  %558 = vmatpush3.bf16.msra.mxu1 %v555_v23  ;;  %v407_v20 = vld [vmem:[#allocation12] ss:$0 sm:$0xff] }
  0x91   :  { %532 = vmatprep.subr.bf16.mxu0 %v531_v26  ;;  %560 = vmatprep.subr.bf16.mxu1 %v559_v29 }
  0x94   :  { %534 = vmatpush3.bf16.msra.mxu0 %v531_v26  ;;  %562 = vmatpush3.bf16.msra.mxu1 %v559_v29 }
  0x95   :  { %536 = vmatprep.subr.bf16.mxu0 %v535_v32  ;;  %564 = vmatprep.subr.bf16.mxu1 %v563_v35 }
  0x98   :  { %538 = vmatpush3.bf16.msra.mxu0 %v535_v32  ;;  %566 = vmatpush3.bf16.msra.mxu1 %v563_v35 }
  0x99   :  { %540 = vmatprep.subr.bf16.mxu0 %v539_v38  ;;  %568 = vmatprep.subr.bf16.mxu1 %v567_v41 }
  0x9c   :  { %542 = vmatpush3.bf16.msra.mxu0 %v539_v38  ;;  %570 = vmatpush3.bf16.msra.mxu1 %v567_v41 }
  0x9d   :  { %544 = vmatprep.subr.bf16.mxu0 %v543_v44  ;;  %572 = vmatprep.subr.bf16.mxu1 %v571_v45 }
  0xa0   :  { %546 = vmatpush3.bf16.msra.mxu0 %v543_v44  ;;  %574 = vmatpush3.bf16.msra.mxu1 %v571_v45 }
  0xa1   :  { %576 = vmatprep.subr.bf16.mxu1 %v575_v49 }
  0xa3   :  { %478 = vmatmul.mubr.f32.vlgmr.msra.gmra.mrb[0].mxu0 %v121_v46 }
  0xa4   :  { %578 = vmatpush3.bf16.msra.mxu1 %v575_v49 }
 0x176   :  { %v479_v51 = vpop.f32.mrb[0].mxu0 }
 0x177   :  { %v217_v52 = vadd.f32 %v479_v51, %v405_v50  ;;  %v211_v53 = vpop.f32.mrb[1].mxu0 }
 0x178   :  { %v212_v54 = vadd.f32 %v405_v50, %v211_v53 }
 0x179   :  { %v221_v56 = vmax.f32 %v217_v52, 0.0 }
 0x17a   :  { %v220_v55 = vmax.f32 %v212_v54, 0.0 }
 0x17c   :  { %512 = vmatprep.mubr.f32.mxu1 %v220_v55 }
 0x17d   :  { %513 = vmatmul.mubr.f32.vlgmr.msra.gmra.mrb[0].mxu1 %v221_v56 }
 0x250   :  { %v514_v58 = vpop.f32.mrb[0].mxu1 }
 0x251   :  { %v306_v59 = vpop.f32.mrb[1].mxu1  ;;  %v332_v60 = vadd.f32 %v514_v58, %v406_v57 }
 0x252   :  { %v331_v61 = vadd.f32 %v406_v57, %v306_v59 }
 0x253   :  { %v336_v63 = vadd.f32 %v332_v60, %v121_v46 }
 0x254   :  { %v335_v62 = vadd.f32 %v331_v61, %v936_v11 }
 0x255   :  { %v342_v1 = vmul.f32 %v336_v63, %v336_v63 }
 0x256   :  { %337 = vadd.xlane.f32.xlu0 %v335_v62  ;;  %v341_v0 = vmul.f32 %v335_v62, %v335_v62 }
 0x258   :  { %343 = vadd.xlane.f32.xlu1 %v341_v0 }
 0x25a   :  { %339 = vadd.xlane.f32.xlu0 %v336_v63 }
 0x25c   :  { %345 = vadd.xlane.f32.xlu1 %v342_v1 }
 0x2e3   :  { %v338_v2 = vpop.xlane.xlu0 %337 }
 0x2e4   :  { %v347_v3 = vmul.f32 0.03125, %v338_v2 }
 0x2e5   :  { %v344_v4 = vpop.xlane.xlu1 %343 }
 0x2e6   :  { %v351_v5 = vmul.f32 %v347_v3, %v347_v3  ;;  %v349_v6 = vmul.f32 0.03125, %v344_v4  ;;  %v357_v18 = vsub.f32 %v335_v62, %v347_v3 }
 0x2e7   :  { %v340_v7 = vpop.xlane.xlu0 %339 }
 0x2e8   :  { %v353_v8 = vsub.f32 %v349_v6, %v351_v5  ;;  %v348_v9 = vmul.f32 0.03125, %v340_v7 }
 0x2e9   :  { %v346_v10 = vpop.xlane.xlu1 %345 }
 0x2ea   :  { %v355_v12 = vmax.f32 %v353_v8, 0.0  ;;  %v352_v13 = vmul.f32 %v348_v9, %v348_v9  ;;  %v350_v14 = vmul.f32 0.03125, %v346_v10  ;;  %v358_v23 = vsub.f32 %v336_v63, %v348_v9 }
 0x2ec   :  { %v359_v11 = vadd.f32 1e-06, %v355_v12  ;;  %v354_v15 = vsub.f32 %v350_v14, %v352_v13 }
 0x2ee   :  { %589 = vrsqrt.f32 %v359_v11  ;;  %v356_v16 = vmax.f32 %v354_v15, 0.0 }
 0x2f0   :  { %v360_v17 = vadd.f32 1e-06, %v356_v16 }
 0x2f2   :  { %591 = vrsqrt.f32 %v360_v17 }
 0x2f8   :  { %v590_v19 = vpop.eup %589 }
 0x2f9   :  { %v363_v21 = vmul.f32 %v590_v19, %v357_v18 }
 0x2fb   :  { %v372_v24 = vmul.f32 %v407_v20, %v363_v21 }
 0x2fc   :  { %v592_v25 = vpop.eup %591 }
 0x2fd   :  { %v364_v26 = vmul.f32 %v592_v25, %v358_v23  ;;  %v381_v27 = vadd.f32 %v408_v22, %v372_v24 }
 0x2ff   :  { %v373_v28 = vmul.f32 %v407_v20, %v364_v26  ;;  %383 = vst [vmem:[#allocation15] sm:$0xff] %v381_v27 }
 0x301   :  { %v382_v29 = vadd.f32 %v408_v22, %v373_v28 }
 0x303   :  { %384 = vst [vmem:[#allocation15 + $0x8] sm:$0xff] %v382_v29 }
 0x304   :  { %758 = shalt.err (!%p755_p4)
}
 0x305   :  { %s759_s20 = scalar_lea.hbm %s962_s7, 256 }
 0x306   :  { %p760_p5 = scmp.ne.s32.totalorder %s962_s7, %s759_s20  ;;  %p763_p6 = scmp.lt.u32.totalorder %s759_s20, %s962_s7 }
 0x308   :  { %p765_p7 = pnand %p763_p6, %p760_p5 }
 0x30a   :  { %768 = shalt.err (!%p765_p7)
}
 0x30b   :  { %396 = dma.vmem_to_hbm [thread:$0]  %s391_s30, 256, %s962_s7, [#allocation5], %s781_s13, %s781_s13, %s782_s14  }
 0x30c   :  { %777 = dma.done.wait [#allocation5], 256  }
 0x30d   :  { %778 = vsyncadd [#allocation5], 4294967040 }
 0x30e   :  { %400 = vsyncpa [#allocation4], 1 }
 0x30f   :  { %401 = vsyncpa [#allocation7], 1 }
 0x310   :  { %402 = vsyncpa [#allocation10], 1 }
 0x311   :  { %403 = vsyncpa [#allocation13], 1 }
 0x312   :  { %404 = vsyncpa [#allocation5], 1 }

</bundles_post_ra>
